<compile_context>
chip_gen: v6e
topology: v6e:2x2x1
jax: 0.10.0
libtpu: 0.0.40
codegen_flags: <defaults>
</compile_context>

<pallas_src>
import functools

import jax
import jax.numpy as jnp
import numpy as np
from jax.experimental import pallas as pl
from jax.experimental.pallas import tpu as pltpu

_PADTOP = 8   # sublane-tile aligned top halo for the H dimension


def _silu(z):
    return z * jax.nn.sigmoid(z)


def _fused_densecat_kernel(x_ref, y_ref,
                           w1_ref, s1_ref, b1_ref,
                           w2_ref, s2_ref, b2_ref,
                           w3_ref, s3_ref, b3_ref,
                           wo_ref, so_ref, bo_ref,
                           out_ref, pad_ref):
    """One grid step = one (x image, y image) pair; everything stays in VMEM.

    Per-step shapes, WC = W*C, WCo = W*Cout:
      x_ref, y_ref : (1, H, WC)          lane-dense input slabs
      w{1,2,3}_ref : (3, WC, WC)         banded block-Toeplitz 3x3 conv weights
      s*/b*_ref    : (1, WC) / (1, WCo)  BN scale/bias tiled along W
      wo_ref       : (WC, WCo)           block-diagonal 1x1 conv_out weight
      out_ref      : (H, WCo)            lane-dense output slab
      pad_ref      : (2, H + 2*_PADTOP, WC) zeroed scratch; rows
                     [_PADTOP, _PADTOP+H) hold the current conv input for the
                     x (slot 0) and y (slot 1) image; the rows just outside
                     stay zero and provide the H-direction "SAME" halo.
    """
    _, H, WC = x_ref.shape
    # Zero once per step: only the halo rows need it, interior is overwritten.
    pad_ref[...] = jnp.zeros_like(pad_ref)

    def conv3x3_bn_silu(w_ref, scale_ref, bias_ref):
        pad = pad_ref[...]                                   # (2, H+2P, WC)
        acc = jnp.zeros((2 * H, WC), jnp.float32)
        for dy in range(3):
            r0 = _PADTOP - 1 + dy
            slab = pad[:, r0:r0 + H, :].reshape(2 * H, WC)   # (2H, WC)
            acc = acc + jnp.dot(slab, w_ref[dy],
                                preferred_element_type=jnp.float32)
        z = acc * scale_ref[...] + bias_ref[...]
        return _silu(z)                                      # (2H, WC)

    # --- stage 1: z1 = conv1([x; y]) ---------------------------------------
    pad_ref[0:1, _PADTOP:_PADTOP + H, :] = x_ref[...]
    pad_ref[1:2, _PADTOP:_PADTOP + H, :] = y_ref[...]
    z1 = conv3x3_bn_silu(w1_ref, s1_ref, b1_ref)

    # --- stage 2: z2 = conv2(z1) --------------------------------------------
    pad_ref[:, _PADTOP:_PADTOP + H, :] = z1.reshape(2, H, WC)
    z2 = conv3x3_bn_silu(w2_ref, s2_ref, b2_ref)

    # --- stage 3: z3 = conv3(z2 + z1) ----------------------------------------
    pad_ref[:, _PADTOP:_PADTOP + H, :] = (z2 + z1).reshape(2, H, WC)
    z3 = conv3x3_bn_silu(w3_ref, s3_ref, b3_ref)

    # --- 6-way sum + 1x1 conv_out + BN + SiLU, lane-dense store --------------
    s = z1 + z2 + z3                                         # (2H, WC)
    ssum = s[0:H, :] + s[H:2 * H, :]                         # x half + y half
    zo = jnp.dot(ssum, wo_ref[...], preferred_element_type=jnp.float32)
    zo = zo * so_ref[...] + bo_ref[...]
    out_ref[...] = _silu(zo).astype(out_ref.dtype)           # (H, WCo)


# ------------------------- host-side weight preparation -------------------------
def _banded_3x3_weight(w_hwio, W):
    """(3,3,Cin,Cout) HWIO -> (3, W*Cin, W*Cout) banded block-Toeplitz weights.

    For kernel row dy the matrix maps a lane-dense input slab row (.., W*Cin) to a
    lane-dense output row (.., W*Cout); the band encodes the 3 W-direction taps AND
    the W-direction zero padding (out-of-range taps simply have zero blocks).
    """
    kH, kW, Cin, Cout = w_hwio.shape
    m = jnp.zeros((kH, W * Cin, W * Cout), w_hwio.dtype)
    for kx in range(kW):
        for w in range(W):
            w_in = w + kx - 1
            if 0 <= w_in < W:
                m = m.at[:, w_in * Cin:(w_in + 1) * Cin,
                         w * Cout:(w + 1) * Cout].set(w_hwio[:, kx])
    return m


def _blockdiag_1x1_weight(w_hwio, W):
    """(1,1,Cin,Cout) HWIO -> (W*Cin, W*Cout) block-diagonal weight."""
    _, _, Cin, Cout = w_hwio.shape
    w2d = w_hwio.reshape(Cin, Cout)
    m = jnp.zeros((W * Cin, W * Cout), w_hwio.dtype)
    for w in range(W):
        m = m.at[w * Cin:(w + 1) * Cin, w * Cout:(w + 1) * Cout].set(w2d)
    return m


def densecat_cat_add_forward(x_nchw, y_nchw, params):
    (w1, s1, b1), (w2, s2, b2), (w3, s3, b3), (wo, so, bo) = params
    N, C, H, W = x_nchw.shape
    Cout = wo.shape[-1]
    WC, WCo = W * C, W * Cout

    # Weight / scale prep (closed-over constants -> folded at compile time).
    w1b = _banded_3x3_weight(w1, W)
    w2b = _banded_3x3_weight(w2, W)
    w3b = _banded_3x3_weight(w3, W)
    wob = _blockdiag_1x1_weight(wo, W)
    s1t, b1t = jnp.tile(s1, (1, W)), jnp.tile(b1, (1, W))
    s2t, b2t = jnp.tile(s2, (1, W)), jnp.tile(b2, (1, W))
    s3t, b3t = jnp.tile(s3, (1, W)), jnp.tile(b3, (1, W))
    sot, bot = jnp.tile(so, (1, W)), jnp.tile(bo, (1, W))

    # NCHW -> lane-dense (N, H, W*C) slabs (layout plumbing outside the kernel).
    x = jnp.transpose(x_nchw, (0, 2, 3, 1)).reshape(N, H, WC)
    y = jnp.transpose(y_nchw, (0, 2, 3, 1)).reshape(N, H, WC)

    def full_spec(shape):
        zeros = (0,) * len(shape)
        return pl.BlockSpec(shape, lambda i: zeros)

    img_spec = pl.BlockSpec((1, H, WC), lambda i: (i, 0, 0))
    out_spec = pl.BlockSpec((H, WCo), lambda i: (i, 0))

    flops = N * (3 * 3 * 2 * (2 * H) * WC * WC + 2 * H * WC * WCo)
    transcendentals = N * (3 * (2 * H) * WC + H * WCo)
    bytes_accessed = 4 * (2 * N * H * WC + N * H * WCo
                          + 3 * 3 * WC * WC + WC * WCo
                          + 2 * (3 * WC + WCo))

    out2d = pl.pallas_call(
        _fused_densecat_kernel,
        out_shape=jax.ShapeDtypeStruct((N * H, WCo), jnp.float32),
        grid=(N,),
        in_specs=[img_spec, img_spec,
                  full_spec(w1b.shape), full_spec(s1t.shape), full_spec(b1t.shape),
                  full_spec(w2b.shape), full_spec(s2t.shape), full_spec(b2t.shape),
                  full_spec(w3b.shape), full_spec(s3t.shape), full_spec(b3t.shape),
                  full_spec(wob.shape), full_spec(sot.shape), full_spec(bot.shape)],
        out_specs=out_spec,
        scratch_shapes=[pltpu.VMEM((2, H + 2 * _PADTOP, WC), jnp.float32)],
        compiler_params=pltpu.CompilerParams(
            dimension_semantics=("parallel",)),
        cost_estimate=pl.CostEstimate(
            flops=flops, transcendentals=transcendentals,
            bytes_accessed=bytes_accessed),
    )(x, y, w1b, s1t, b1t, w2b, s2t, b2t, w3b, s3t, b3t, wob, sot, bot)

    out = out2d.reshape(N, H, W, Cout)
    return jnp.transpose(out, (0, 3, 1, 2))   # NHWC-dense -> NCHW


# ----------------------------- parameter initialization -----------------------------
def init_params(key, in_chn, out_chn):
    """Deterministic synthetic params. BN (eval: mean=0, var=1) + conv bias folded
    into per-channel (scale, bias)."""
    keys = jax.random.split(key, 16)
    eps = 1e-5

    def make(kw, kb, kg, kbeta, cin, cout, ksize):
        w = 0.1 * jax.random.normal(kw, (ksize, ksize, cin, cout), jnp.float32)
        cb = 0.1 * jax.random.normal(kb, (cout,), jnp.float32)
        gamma = 1.0 + 0.1 * jax.random.normal(kg, (cout,), jnp.float32)
        beta = 0.1 * jax.random.normal(kbeta, (cout,), jnp.float32)
        mean = jnp.zeros((cout,), jnp.float32)
        var = jnp.ones((cout,), jnp.float32)
        scale = gamma / jnp.sqrt(var + eps)
        bias = beta + scale * (cb - mean)
        return w, scale.reshape(1, cout), bias.reshape(1, cout)

    p1 = make(keys[0], keys[1], keys[2], keys[3], in_chn, in_chn, 3)
    p2 = make(keys[4], keys[5], keys[6], keys[7], in_chn, in_chn, 3)
    p3 = make(keys[8], keys[9], keys[10], keys[11], in_chn, in_chn, 3)
    po = make(keys[12], keys[13], keys[14], keys[15], in_chn, out_chn, 1)
    return p1, p2, p3, po


# ---------------- pure-JAX reference (silent correctness check) ----------------
def _ref_block(x, w, scale, bias):
    z = jax.lax.conv_general_dilated(
        x, w, (1, 1), "SAME", dimension_numbers=("NHWC", "HWIO", "NHWC"))
    z = z * scale.reshape(1, 1, 1, -1) + bias.reshape(1, 1, 1, -1)
    return _silu(z)


def reference_forward(x_nchw, y_nchw, params):
    (w1, s1, b1), (w2, s2, b2), (w3, s3, b3), (wo, so, bo) = params
    x = jnp.transpose(x_nchw, (0, 2, 3, 1))
    y = jnp.transpose(y_nchw, (0, 2, 3, 1))
    x1 = _ref_block(x, w1, s1, b1)
    x2 = _ref_block(x1, w2, s2, b2)
    x3 = _ref_block(x2 + x1, w3, s3, b3)
    y1 = _ref_block(y, w1, s1, b1)
    y2 = _ref_block(y1, w2, s2, b2)
    y3 = _ref_block(y2 + y1, w3, s3, b3)
    out = _ref_block(x1 + x2 + x3 + y1 + y2 + y3, wo, so, bo)
    return jnp.transpose(out, (0, 3, 1, 2))


if __name__ == "__main__":
    key = jax.random.PRNGKey(0)
    kx, ky, kp = jax.random.split(key, 3)

    N, C, H, W = 2, 4, 16, 16   # NCHW, matching the PyTorch module interface
    OUT_CHN = 8

    x = jax.random.normal(kx, (N, C, H, W), jnp.float32)
    y = jax.random.normal(ky, (N, C, H, W), jnp.float32)
    params = init_params(kp, C, OUT_CHN)

    fwd = jax.jit(functools.partial(densecat_cat_add_forward, params=params))
    out = jax.block_until_ready(fwd(x, y))

    assert out.shape == (N, OUT_CHN, H, W)
    ref = reference_forward(x, y, params)
    np.testing.assert_allclose(np.asarray(out), np.asarray(ref),
                               rtol=1e-3, atol=1e-3)
    print("KERNEL_OK")
</pallas_src>

<mosaic_0001>
module attributes {stable_mosaic.version = 11 : i64} {
  func.func @_fused_densecat_kernel(%arg0: i32, %arg1: memref<1x16x64xf32, #tpu.memory_space<vmem>>, %arg2: memref<1x16x64xf32, #tpu.memory_space<vmem>>, %arg3: memref<3x64x64xf32, #tpu.memory_space<vmem>>, %arg4: memref<1x64xf32, #tpu.memory_space<vmem>>, %arg5: memref<1x64xf32, #tpu.memory_space<vmem>>, %arg6: memref<3x64x64xf32, #tpu.memory_space<vmem>>, %arg7: memref<1x64xf32, #tpu.memory_space<vmem>>, %arg8: memref<1x64xf32, #tpu.memory_space<vmem>>, %arg9: memref<3x64x64xf32, #tpu.memory_space<vmem>>, %arg10: memref<1x64xf32, #tpu.memory_space<vmem>>, %arg11: memref<1x64xf32, #tpu.memory_space<vmem>>, %arg12: memref<64x128xf32, #tpu.memory_space<vmem>>, %arg13: memref<1x128xf32, #tpu.memory_space<vmem>>, %arg14: memref<1x128xf32, #tpu.memory_space<vmem>>, %arg15: memref<16x128xf32, #tpu.memory_space<vmem>>, %arg16: memref<2x32x64xf32, #tpu.memory_space<vmem>>) attributes {dimension_semantics = [#tpu.dimension_semantics<parallel>], iteration_bounds = array<i64: 2>, scalar_prefetch = 0 : i64, scratch_operands = 1 : i64, tpu.core_type = #tpu.core_type<tc>, window_params = [{transform_indices = @transform_0, window_bounds = array<i64: 1, 16, 64>}, {transform_indices = @transform_1, window_bounds = array<i64: 1, 16, 64>}, {pipeline_mode = #tpu.pipeline_mode<synchronous>, transform_indices = @transform_2, window_bounds = array<i64: 3, 64, 64>}, {pipeline_mode = #tpu.pipeline_mode<synchronous>, transform_indices = @transform_3, window_bounds = array<i64: 1, 64>}, {pipeline_mode = #tpu.pipeline_mode<synchronous>, transform_indices = @transform_4, window_bounds = array<i64: 1, 64>}, {pipeline_mode = #tpu.pipeline_mode<synchronous>, transform_indices = @transform_5, window_bounds = array<i64: 3, 64, 64>}, {pipeline_mode = #tpu.pipeline_mode<synchronous>, transform_indices = @transform_6, window_bounds = array<i64: 1, 64>}, {pipeline_mode = #tpu.pipeline_mode<synchronous>, transform_indices = @transform_7, window_bounds = array<i64: 1, 64>}, {pipeline_mode = #tpu.pipeline_mode<synchronous>, transform_indices = @transform_8, window_bounds = array<i64: 3, 64, 64>}, {pipeline_mode = #tpu.pipeline_mode<synchronous>, transform_indices = @transform_9, window_bounds = array<i64: 1, 64>}, {pipeline_mode = #tpu.pipeline_mode<synchronous>, transform_indices = @transform_10, window_bounds = array<i64: 1, 64>}, {pipeline_mode = #tpu.pipeline_mode<synchronous>, transform_indices = @transform_11, window_bounds = array<i64: 64, 128>}, {pipeline_mode = #tpu.pipeline_mode<synchronous>, transform_indices = @transform_12, window_bounds = array<i64: 1, 128>}, {pipeline_mode = #tpu.pipeline_mode<synchronous>, transform_indices = @transform_13, window_bounds = array<i64: 1, 128>}, {transform_indices = @transform_14, window_bounds = array<i64: 16, 128>}]} {
    %cst = arith.constant 0.000000e+00 : f32
    %0 = vector.broadcast %cst : f32 to vector<2x32x64xf32>
    %c0 = arith.constant 0 : index
    %c0_0 = arith.constant 0 : index
    %c0_1 = arith.constant 0 : index
    %1 = vector.load %arg16[%c0, %c0_0, %c0_1] : memref<2x32x64xf32, #tpu.memory_space<vmem>>, vector<2x32x64xf32>
    tpu.vector_store %arg16[%c0, %c0_0, %c0_1], %0 {strides = array<i32>} : memref<2x32x64xf32, #tpu.memory_space<vmem>>, vector<2x32x64xf32>,
    %c0_2 = arith.constant 0 : index
    %c0_3 = arith.constant 0 : index
    %c0_4 = arith.constant 0 : index
    %2 = vector.load %arg1[%c0_2, %c0_3, %c0_4] : memref<1x16x64xf32, #tpu.memory_space<vmem>>, vector<1x16x64xf32>
    %c0_5 = arith.constant 0 : index
    %c8 = arith.constant 8 : index
    %c0_6 = arith.constant 0 : index
    %3 = vector.load %arg16[%c0_5, %c8, %c0_6] : memref<2x32x64xf32, #tpu.memory_space<vmem>>, vector<1x16x64xf32>
    tpu.vector_store %arg16[%c0_5, %c8, %c0_6], %2 {strides = array<i32>} : memref<2x32x64xf32, #tpu.memory_space<vmem>>, vector<1x16x64xf32>,
    %c0_7 = arith.constant 0 : index
    %c0_8 = arith.constant 0 : index
    %c0_9 = arith.constant 0 : index
    %4 = vector.load %arg2[%c0_7, %c0_8, %c0_9] : memref<1x16x64xf32, #tpu.memory_space<vmem>>, vector<1x16x64xf32>
    %c1 = arith.constant 1 : index
    %c8_10 = arith.constant 8 : index
    %c0_11 = arith.constant 0 : index
    %5 = vector.load %arg16[%c1, %c8_10, %c0_11] : memref<2x32x64xf32, #tpu.memory_space<vmem>>, vector<1x16x64xf32>
    tpu.vector_store %arg16[%c1, %c8_10, %c0_11], %4 {strides = array<i32>} : memref<2x32x64xf32, #tpu.memory_space<vmem>>, vector<1x16x64xf32>,
    %c0_12 = arith.constant 0 : index
    %c0_13 = arith.constant 0 : index
    %c0_14 = arith.constant 0 : index
    %6 = vector.load %arg16[%c0_12, %c0_13, %c0_14] : memref<2x32x64xf32, #tpu.memory_space<vmem>>, vector<2x32x64xf32>
    %cst_15 = arith.constant 0.000000e+00 : f32
    %7 = vector.broadcast %cst_15 : f32 to vector<32x64xf32>
    %8 = vector.extract_strided_slice %6 {offsets = [0, 7, 0], sizes = [2, 16, 64], strides = [1, 1, 1]} : vector<2x32x64xf32> to vector<2x16x64xf32>
    %9 = vector.shape_cast %8 : vector<2x16x64xf32> to vector<32x64xf32>
    %c0_16 = arith.constant 0 : index
    %c0_17 = arith.constant 0 : index
    %c0_18 = arith.constant 0 : index
    %10 = vector.load %arg3[%c0_16, %c0_17, %c0_18] : memref<3x64x64xf32, #tpu.memory_space<vmem>>, vector<1x64x64xf32>
    %11 = vector.shape_cast %10 : vector<1x64x64xf32> to vector<64x64xf32>
    %cst_19 = arith.constant dense<0.000000e+00> : vector<32x64xf32>
    %12 = tpu.matmul %9, %11, %cst_19 {dimension_numbers = #tpu.dot_dimension_numbers<[1], [0], [0], [1], [0, 0, 1, 1], [], []>} : vector<32x64xf32>, vector<64x64xf32>, vector<32x64xf32> -> vector<32x64xf32>
    %13 = arith.addf %7, %12 : vector<32x64xf32>
    %14 = vector.extract_strided_slice %6 {offsets = [0, 8, 0], sizes = [2, 16, 64], strides = [1, 1, 1]} : vector<2x32x64xf32> to vector<2x16x64xf32>
    %15 = vector.shape_cast %14 : vector<2x16x64xf32> to vector<32x64xf32>
    %c1_20 = arith.constant 1 : index
    %c0_21 = arith.constant 0 : index
    %c0_22 = arith.constant 0 : index
    %16 = vector.load %arg3[%c1_20, %c0_21, %c0_22] : memref<3x64x64xf32, #tpu.memory_space<vmem>>, vector<1x64x64xf32>
    %17 = vector.shape_cast %16 : vector<1x64x64xf32> to vector<64x64xf32>
    %cst_23 = arith.constant dense<0.000000e+00> : vector<32x64xf32>
    %18 = tpu.matmul %15, %17, %cst_23 {dimension_numbers = #tpu.dot_dimension_numbers<[1], [0], [0], [1], [0, 0, 1, 1], [], []>} : vector<32x64xf32>, vector<64x64xf32>, vector<32x64xf32> -> vector<32x64xf32>
    %19 = arith.addf %13, %18 : vector<32x64xf32>
    %20 = vector.extract_strided_slice %6 {offsets = [0, 9, 0], sizes = [2, 16, 64], strides = [1, 1, 1]} : vector<2x32x64xf32> to vector<2x16x64xf32>
    %21 = vector.shape_cast %20 : vector<2x16x64xf32> to vector<32x64xf32>
    %c2 = arith.constant 2 : index
    %c0_24 = arith.constant 0 : index
    %c0_25 = arith.constant 0 : index
    %22 = vector.load %arg3[%c2, %c0_24, %c0_25] : memref<3x64x64xf32, #tpu.memory_space<vmem>>, vector<1x64x64xf32>
    %23 = vector.shape_cast %22 : vector<1x64x64xf32> to vector<64x64xf32>
    %cst_26 = arith.constant dense<0.000000e+00> : vector<32x64xf32>
    %24 = tpu.matmul %21, %23, %cst_26 {dimension_numbers = #tpu.dot_dimension_numbers<[1], [0], [0], [1], [0, 0, 1, 1], [], []>} : vector<32x64xf32>, vector<64x64xf32>, vector<32x64xf32> -> vector<32x64xf32>
    %25 = arith.addf %19, %24 : vector<32x64xf32>
    %c0_27 = arith.constant 0 : index
    %c0_28 = arith.constant 0 : index
    %26 = vector.load %arg4[%c0_27, %c0_28] : memref<1x64xf32, #tpu.memory_space<vmem>>, vector<1x64xf32>
    %27 = vector.broadcast %26 : vector<1x64xf32> to vector<32x64xf32>
    %28 = arith.mulf %25, %27 : vector<32x64xf32>
    %c0_29 = arith.constant 0 : index
    %c0_30 = arith.constant 0 : index
    %29 = vector.load %arg5[%c0_29, %c0_30] : memref<1x64xf32, #tpu.memory_space<vmem>>, vector<1x64xf32>
    %30 = vector.broadcast %29 : vector<1x64xf32> to vector<32x64xf32>
    %31 = arith.addf %28, %30 : vector<32x64xf32>
    %32 = arith.negf %31 : vector<32x64xf32>
    %33 = math.exp %32 : vector<32x64xf32>
    %cst_31 = arith.constant 1.000000e+00 : f32
    %34 = vector.broadcast %cst_31 : f32 to vector<32x64xf32>
    %35 = arith.addf %34, %33 : vector<32x64xf32>
    %36 = arith.divf %34, %35 : vector<32x64xf32>
    %37 = arith.mulf %31, %36 : vector<32x64xf32>
    %38 = vector.shape_cast %37 : vector<32x64xf32> to vector<2x16x64xf32>
    %c0_32 = arith.constant 0 : index
    %c8_33 = arith.constant 8 : index
    %c0_34 = arith.constant 0 : index
    %39 = vector.load %arg16[%c0_32, %c8_33, %c0_34] : memref<2x32x64xf32, #tpu.memory_space<vmem>>, vector<2x16x64xf32>
    tpu.vector_store %arg16[%c0_32, %c8_33, %c0_34], %38 {strides = array<i32>} : memref<2x32x64xf32, #tpu.memory_space<vmem>>, vector<2x16x64xf32>,
    %c0_35 = arith.constant 0 : index
    %c0_36 = arith.constant 0 : index
    %c0_37 = arith.constant 0 : index
    %40 = vector.load %arg16[%c0_35, %c0_36, %c0_37] : memref<2x32x64xf32, #tpu.memory_space<vmem>>, vector<2x32x64xf32>
    %cst_38 = arith.constant 0.000000e+00 : f32
    %41 = vector.broadcast %cst_38 : f32 to vector<32x64xf32>
    %42 = vector.extract_strided_slice %40 {offsets = [0, 7, 0], sizes = [2, 16, 64], strides = [1, 1, 1]} : vector<2x32x64xf32> to vector<2x16x64xf32>
    %43 = vector.shape_cast %42 : vector<2x16x64xf32> to vector<32x64xf32>
    %c0_39 = arith.constant 0 : index
    %c0_40 = arith.constant 0 : index
    %c0_41 = arith.constant 0 : index
    %44 = vector.load %arg6[%c0_39, %c0_40, %c0_41] : memref<3x64x64xf32, #tpu.memory_space<vmem>>, vector<1x64x64xf32>
    %45 = vector.shape_cast %44 : vector<1x64x64xf32> to vector<64x64xf32>
    %cst_42 = arith.constant dense<0.000000e+00> : vector<32x64xf32>
    %46 = tpu.matmul %43, %45, %cst_42 {dimension_numbers = #tpu.dot_dimension_numbers<[1], [0], [0], [1], [0, 0, 1, 1], [], []>} : vector<32x64xf32>, vector<64x64xf32>, vector<32x64xf32> -> vector<32x64xf32>
    %47 = arith.addf %41, %46 : vector<32x64xf32>
    %48 = vector.extract_strided_slice %40 {offsets = [0, 8, 0], sizes = [2, 16, 64], strides = [1, 1, 1]} : vector<2x32x64xf32> to vector<2x16x64xf32>
    %49 = vector.shape_cast %48 : vector<2x16x64xf32> to vector<32x64xf32>
    %c1_43 = arith.constant 1 : index
    %c0_44 = arith.constant 0 : index
    %c0_45 = arith.constant 0 : index
    %50 = vector.load %arg6[%c1_43, %c0_44, %c0_45] : memref<3x64x64xf32, #tpu.memory_space<vmem>>, vector<1x64x64xf32>
    %51 = vector.shape_cast %50 : vector<1x64x64xf32> to vector<64x64xf32>
    %cst_46 = arith.constant dense<0.000000e+00> : vector<32x64xf32>
    %52 = tpu.matmul %49, %51, %cst_46 {dimension_numbers = #tpu.dot_dimension_numbers<[1], [0], [0], [1], [0, 0, 1, 1], [], []>} : vector<32x64xf32>, vector<64x64xf32>, vector<32x64xf32> -> vector<32x64xf32>
    %53 = arith.addf %47, %52 : vector<32x64xf32>
    %54 = vector.extract_strided_slice %40 {offsets = [0, 9, 0], sizes = [2, 16, 64], strides = [1, 1, 1]} : vector<2x32x64xf32> to vector<2x16x64xf32>
    %55 = vector.shape_cast %54 : vector<2x16x64xf32> to vector<32x64xf32>
    %c2_47 = arith.constant 2 : index
    %c0_48 = arith.constant 0 : index
    %c0_49 = arith.constant 0 : index
    %56 = vector.load %arg6[%c2_47, %c0_48, %c0_49] : memref<3x64x64xf32, #tpu.memory_space<vmem>>, vector<1x64x64xf32>
    %57 = vector.shape_cast %56 : vector<1x64x64xf32> to vector<64x64xf32>
    %cst_50 = arith.constant dense<0.000000e+00> : vector<32x64xf32>
    %58 = tpu.matmul %55, %57, %cst_50 {dimension_numbers = #tpu.dot_dimension_numbers<[1], [0], [0], [1], [0, 0, 1, 1], [], []>} : vector<32x64xf32>, vector<64x64xf32>, vector<32x64xf32> -> vector<32x64xf32>
    %59 = arith.addf %53, %58 : vector<32x64xf32>
    %c0_51 = arith.constant 0 : index
    %c0_52 = arith.constant 0 : index
    %60 = vector.load %arg7[%c0_51, %c0_52] : memref<1x64xf32, #tpu.memory_space<vmem>>, vector<1x64xf32>
    %61 = vector.broadcast %60 : vector<1x64xf32> to vector<32x64xf32>
    %62 = arith.mulf %59, %61 : vector<32x64xf32>
    %c0_53 = arith.constant 0 : index
    %c0_54 = arith.constant 0 : index
    %63 = vector.load %arg8[%c0_53, %c0_54] : memref<1x64xf32, #tpu.memory_space<vmem>>, vector<1x64xf32>
    %64 = vector.broadcast %63 : vector<1x64xf32> to vector<32x64xf32>
    %65 = arith.addf %62, %64 : vector<32x64xf32>
    %66 = arith.negf %65 : vector<32x64xf32>
    %67 = math.exp %66 : vector<32x64xf32>
    %cst_55 = arith.constant 1.000000e+00 : f32
    %68 = vector.broadcast %cst_55 : f32 to vector<32x64xf32>
    %69 = arith.addf %68, %67 : vector<32x64xf32>
    %70 = arith.divf %68, %69 : vector<32x64xf32>
    %71 = arith.mulf %65, %70 : vector<32x64xf32>
    %72 = arith.addf %71, %37 : vector<32x64xf32>
    %73 = vector.shape_cast %72 : vector<32x64xf32> to vector<2x16x64xf32>
    %c0_56 = arith.constant 0 : index
    %c8_57 = arith.constant 8 : index
    %c0_58 = arith.constant 0 : index
    %74 = vector.load %arg16[%c0_56, %c8_57, %c0_58] : memref<2x32x64xf32, #tpu.memory_space<vmem>>, vector<2x16x64xf32>
    tpu.vector_store %arg16[%c0_56, %c8_57, %c0_58], %73 {strides = array<i32>} : memref<2x32x64xf32, #tpu.memory_space<vmem>>, vector<2x16x64xf32>,
    %c0_59 = arith.constant 0 : index
    %c0_60 = arith.constant 0 : index
    %c0_61 = arith.constant 0 : index
    %75 = vector.load %arg16[%c0_59, %c0_60, %c0_61] : memref<2x32x64xf32, #tpu.memory_space<vmem>>, vector<2x32x64xf32>
    %cst_62 = arith.constant 0.000000e+00 : f32
    %76 = vector.broadcast %cst_62 : f32 to vector<32x64xf32>
    %77 = vector.extract_strided_slice %75 {offsets = [0, 7, 0], sizes = [2, 16, 64], strides = [1, 1, 1]} : vector<2x32x64xf32> to vector<2x16x64xf32>
    %78 = vector.shape_cast %77 : vector<2x16x64xf32> to vector<32x64xf32>
    %c0_63 = arith.constant 0 : index
    %c0_64 = arith.constant 0 : index
    %c0_65 = arith.constant 0 : index
    %79 = vector.load %arg9[%c0_63, %c0_64, %c0_65] : memref<3x64x64xf32, #tpu.memory_space<vmem>>, vector<1x64x64xf32>
    %80 = vector.shape_cast %79 : vector<1x64x64xf32> to vector<64x64xf32>
    %cst_66 = arith.constant dense<0.000000e+00> : vector<32x64xf32>
    %81 = tpu.matmul %78, %80, %cst_66 {dimension_numbers = #tpu.dot_dimension_numbers<[1], [0], [0], [1], [0, 0, 1, 1], [], []>} : vector<32x64xf32>, vector<64x64xf32>, vector<32x64xf32> -> vector<32x64xf32>
    %82 = arith.addf %76, %81 : vector<32x64xf32>
    %83 = vector.extract_strided_slice %75 {offsets = [0, 8, 0], sizes = [2, 16, 64], strides = [1, 1, 1]} : vector<2x32x64xf32> to vector<2x16x64xf32>
    %84 = vector.shape_cast %83 : vector<2x16x64xf32> to vector<32x64xf32>
    %c1_67 = arith.constant 1 : index
    %c0_68 = arith.constant 0 : index
    %c0_69 = arith.constant 0 : index
    %85 = vector.load %arg9[%c1_67, %c0_68, %c0_69] : memref<3x64x64xf32, #tpu.memory_space<vmem>>, vector<1x64x64xf32>
    %86 = vector.shape_cast %85 : vector<1x64x64xf32> to vector<64x64xf32>
    %cst_70 = arith.constant dense<0.000000e+00> : vector<32x64xf32>
    %87 = tpu.matmul %84, %86, %cst_70 {dimension_numbers = #tpu.dot_dimension_numbers<[1], [0], [0], [1], [0, 0, 1, 1], [], []>} : vector<32x64xf32>, vector<64x64xf32>, vector<32x64xf32> -> vector<32x64xf32>
    %88 = arith.addf %82, %87 : vector<32x64xf32>
    %89 = vector.extract_strided_slice %75 {offsets = [0, 9, 0], sizes = [2, 16, 64], strides = [1, 1, 1]} : vector<2x32x64xf32> to vector<2x16x64xf32>
    %90 = vector.shape_cast %89 : vector<2x16x64xf32> to vector<32x64xf32>
    %c2_71 = arith.constant 2 : index
    %c0_72 = arith.constant 0 : index
    %c0_73 = arith.constant 0 : index
    %91 = vector.load %arg9[%c2_71, %c0_72, %c0_73] : memref<3x64x64xf32, #tpu.memory_space<vmem>>, vector<1x64x64xf32>
    %92 = vector.shape_cast %91 : vector<1x64x64xf32> to vector<64x64xf32>
    %cst_74 = arith.constant dense<0.000000e+00> : vector<32x64xf32>
    %93 = tpu.matmul %90, %92, %cst_74 {dimension_numbers = #tpu.dot_dimension_numbers<[1], [0], [0], [1], [0, 0, 1, 1], [], []>} : vector<32x64xf32>, vector<64x64xf32>, vector<32x64xf32> -> vector<32x64xf32>
    %94 = arith.addf %88, %93 : vector<32x64xf32>
    %c0_75 = arith.constant 0 : index
    %c0_76 = arith.constant 0 : index
    %95 = vector.load %arg10[%c0_75, %c0_76] : memref<1x64xf32, #tpu.memory_space<vmem>>, vector<1x64xf32>
    %96 = vector.broadcast %95 : vector<1x64xf32> to vector<32x64xf32>
    %97 = arith.mulf %94, %96 : vector<32x64xf32>
    %c0_77 = arith.constant 0 : index
    %c0_78 = arith.constant 0 : index
    %98 = vector.load %arg11[%c0_77, %c0_78] : memref<1x64xf32, #tpu.memory_space<vmem>>, vector<1x64xf32>
    %99 = vector.broadcast %98 : vector<1x64xf32> to vector<32x64xf32>
    %100 = arith.addf %97, %99 : vector<32x64xf32>
    %101 = arith.negf %100 : vector<32x64xf32>
    %102 = math.exp %101 : vector<32x64xf32>
    %cst_79 = arith.constant 1.000000e+00 : f32
    %103 = vector.broadcast %cst_79 : f32 to vector<32x64xf32>
    %104 = arith.addf %103, %102 : vector<32x64xf32>
    %105 = arith.divf %103, %104 : vector<32x64xf32>
    %106 = arith.mulf %100, %105 : vector<32x64xf32>
    %107 = arith.addf %37, %71 : vector<32x64xf32>
    %108 = arith.addf %107, %106 : vector<32x64xf32>
    %109 = vector.extract_strided_slice %108 {offsets = [0, 0], sizes = [16, 64], strides = [1, 1]} : vector<32x64xf32> to vector<16x64xf32>
    %110 = vector.extract_strided_slice %108 {offsets = [16, 0], sizes = [16, 64], strides = [1, 1]} : vector<32x64xf32> to vector<16x64xf32>
    %111 = arith.addf %109, %110 : vector<16x64xf32>
    %c0_80 = arith.constant 0 : index
    %c0_81 = arith.constant 0 : index
    %112 = vector.load %arg12[%c0_80, %c0_81] : memref<64x128xf32, #tpu.memory_space<vmem>>, vector<64x128xf32>
    %cst_82 = arith.constant dense<0.000000e+00> : vector<16x128xf32>
    %113 = tpu.matmul %111, %112, %cst_82 {dimension_numbers = #tpu.dot_dimension_numbers<[1], [0], [0], [1], [0, 0, 1, 1], [], []>} : vector<16x64xf32>, vector<64x128xf32>, vector<16x128xf32> -> vector<16x128xf32>
    %c0_83 = arith.constant 0 : index
    %c0_84 = arith.constant 0 : index
    %114 = vector.load %arg13[%c0_83, %c0_84] : memref<1x128xf32, #tpu.memory_space<vmem>>, vector<1x128xf32>
    %115 = vector.broadcast %114 : vector<1x128xf32> to vector<16x128xf32>
    %116 = arith.mulf %113, %115 : vector<16x128xf32>
    %c0_85 = arith.constant 0 : index
    %c0_86 = arith.constant 0 : index
    %117 = vector.load %arg14[%c0_85, %c0_86] : memref<1x128xf32, #tpu.memory_space<vmem>>, vector<1x128xf32>
    %118 = vector.broadcast %117 : vector<1x128xf32> to vector<16x128xf32>
    %119 = arith.addf %116, %118 : vector<16x128xf32>
    %120 = arith.negf %119 : vector<16x128xf32>
    %121 = math.exp %120 : vector<16x128xf32>
    %cst_87 = arith.constant 1.000000e+00 : f32
    %122 = vector.broadcast %cst_87 : f32 to vector<16x128xf32>
    %123 = arith.addf %122, %121 : vector<16x128xf32>
    %124 = arith.divf %122, %123 : vector<16x128xf32>
    %125 = arith.mulf %119, %124 : vector<16x128xf32>
    %c0_88 = arith.constant 0 : index
    %c0_89 = arith.constant 0 : index
    %126 = vector.load %arg15[%c0_88, %c0_89] : memref<16x128xf32, #tpu.memory_space<vmem>>, vector<16x128xf32>
    tpu.vector_store %arg15[%c0_88, %c0_89], %125 {strides = array<i32>} : memref<16x128xf32, #tpu.memory_space<vmem>>, vector<16x128xf32>,
    return
  }
  func.func @transform_0(%arg0: i32) -> (i32, i32, i32) {
    %c0_i32 = arith.constant 0 : i32
    %c0_i32_0 = arith.constant 0 : i32
    %c0_i32_1 = arith.constant 0 : i32
    return %arg0, %c0_i32, %c0_i32_0 : i32, i32, i32
  }
  func.func @transform_1(%arg0: i32) -> (i32, i32, i32) {
    %c0_i32 = arith.constant 0 : i32
    %c0_i32_0 = arith.constant 0 : i32
    %c0_i32_1 = arith.constant 0 : i32
    return %arg0, %c0_i32, %c0_i32_0 : i32, i32, i32
  }
  func.func @transform_2(%arg0: i32) -> (i32, i32, i32) {
    %c0_i32 = arith.constant 0 : i32
    %c0_i32_0 = arith.constant 0 : i32
    %c0_i32_1 = arith.constant 0 : i32
    %c0_i32_2 = arith.constant 0 : i32
    return %c0_i32, %c0_i32_0, %c0_i32_1 : i32, i32, i32
  }
  func.func @transform_3(%arg0: i32) -> (i32, i32) {
    %c0_i32 = arith.constant 0 : i32
    %c0_i32_0 = arith.constant 0 : i32
    %c0_i32_1 = arith.constant 0 : i32
    return %c0_i32, %c0_i32_0 : i32, i32
  }
  func.func @transform_4(%arg0: i32) -> (i32, i32) {
    %c0_i32 = arith.constant 0 : i32
    %c0_i32_0 = arith.constant 0 : i32
    %c0_i32_1 = arith.constant 0 : i32
    return %c0_i32, %c0_i32_0 : i32, i32
  }
  func.func @transform_5(%arg0: i32) -> (i32, i32, i32) {
    %c0_i32 = arith.constant 0 : i32
    %c0_i32_0 = arith.constant 0 : i32
    %c0_i32_1 = arith.constant 0 : i32
    %c0_i32_2 = arith.constant 0 : i32
    return %c0_i32, %c0_i32_0, %c0_i32_1 : i32, i32, i32
  }
  func.func @transform_6(%arg0: i32) -> (i32, i32) {
    %c0_i32 = arith.constant 0 : i32
    %c0_i32_0 = arith.constant 0 : i32
    %c0_i32_1 = arith.constant 0 : i32
    return %c0_i32, %c0_i32_0 : i32, i32
  }
  func.func @transform_7(%arg0: i32) -> (i32, i32) {
    %c0_i32 = arith.constant 0 : i32
    %c0_i32_0 = arith.constant 0 : i32
    %c0_i32_1 = arith.constant 0 : i32
    return %c0_i32, %c0_i32_0 : i32, i32
  }
  func.func @transform_8(%arg0: i32) -> (i32, i32, i32) {
    %c0_i32 = arith.constant 0 : i32
    %c0_i32_0 = arith.constant 0 : i32
    %c0_i32_1 = arith.constant 0 : i32
    %c0_i32_2 = arith.constant 0 : i32
    return %c0_i32, %c0_i32_0, %c0_i32_1 : i32, i32, i32
  }
  func.func @transform_9(%arg0: i32) -> (i32, i32) {
    %c0_i32 = arith.constant 0 : i32
    %c0_i32_0 = arith.constant 0 : i32
    %c0_i32_1 = arith.constant 0 : i32
    return %c0_i32, %c0_i32_0 : i32, i32
  }
  func.func @transform_10(%arg0: i32) -> (i32, i32) {
    %c0_i32 = arith.constant 0 : i32
    %c0_i32_0 = arith.constant 0 : i32
    %c0_i32_1 = arith.constant 0 : i32
    return %c0_i32, %c0_i32_0 : i32, i32
  }
  func.func @transform_11(%arg0: i32) -> (i32, i32) {
    %c0_i32 = arith.constant 0 : i32
    %c0_i32_0 = arith.constant 0 : i32
    %c0_i32_1 = arith.constant 0 : i32
    return %c0_i32, %c0_i32_0 : i32, i32
  }
  func.func @transform_12(%arg0: i32) -> (i32, i32) {
    %c0_i32 = arith.constant 0 : i32
    %c0_i32_0 = arith.constant 0 : i32
    %c0_i32_1 = arith.constant 0 : i32
    return %c0_i32, %c0_i32_0 : i32, i32
  }
  func.func @transform_13(%arg0: i32) -> (i32, i32) {
    %c0_i32 = arith.constant 0 : i32
    %c0_i32_0 = arith.constant 0 : i32
    %c0_i32_1 = arith.constant 0 : i32
    return %c0_i32, %c0_i32_0 : i32, i32
  }
  func.func @transform_14(%arg0: i32) -> (i32, i32) {
    %c0_i32 = arith.constant 0 : i32
    %c0_i32_0 = arith.constant 0 : i32
    return %arg0, %c0_i32 : i32, i32
  }
}

</mosaic_0001>

<bundles_post_ra>
// kernel: densecat_cat_add_forward.1
= control target key start
LH: loop header
LB: loop body
LE: loop exit
PB: predicated region body
PF: predicated region fallthrough
CT: control target
= control target key end

     0   :  { %s2510_s29 = smov 0   ;;  %s2943_s0 = inlined_call_operand.vmem [shape: f32[2,16,64], index: 0, kind: input, shape index: {}]   ;;  %s2944_s1 = inlined_call_operand.vmem [shape: f32[2,16,64], index: 1, kind: input, shape index: {}]   ;;  %s2945_s2 = inlined_call_operand.vmem [shape: f32[3,64,64], index: 2, kind: input, shape index: {}]   ;;  %s2946_s3 = inlined_call_operand.vmem [shape: f32[1,64], index: 3, kind: input, shape index: {}]   ;;  %s2947_s4 = inlined_call_operand.vmem [shape: f32[1,64], index: 4, kind: input, shape index: {}]   ;;  %s2948_s5 = inlined_call_operand.vmem [shape: f32[3,64,64], index: 5, kind: input, shape index: {}]   ;;  %s2949_s6 = inlined_call_operand.vmem [shape: f32[1,64], index: 6, kind: input, shape index: {}]   ;;  %s2950_s7 = inlined_call_operand.vmem [shape: f32[1,64], index: 7, kind: input, shape index: {}]   ;;  %s2951_s8 = inlined_call_operand.vmem [shape: f32[3,64,64], index: 8, kind: input, shape index: {}]   ;;  %s2952_s9 = inlined_call_operand.vmem [shape: f32[1,64], index: 9, kind: input, shape index: {}]   ;;  %s2953_s10 = inlined_call_operand.vmem [shape: f32[1,64], index: 10, kind: input, shape index: {}]   ;;  %s2954_s11 = inlined_call_operand.vmem [shape: f32[64,128], index: 11, kind: input, shape index: {}]   ;;  %s2955_s12 = inlined_call_operand.vmem [shape: f32[1,128], index: 12, kind: input, shape index: {}]   ;;  %s2956_s13 = inlined_call_operand.vmem [shape: f32[1,128], index: 13, kind: input, shape index: {}]   ;;  %s2957_s14 = inlined_call_operand.vmem [shape: f32[32,128], index: 14, kind: output, shape index: {}]  }
   0x1 LB: > { %s2516_s30 = sadd.s32 4294967295, %s2432_s29   ;;  %p1907_p0 = scmp.ge.s32.totalorder %s2432_s29, 1  ;;  %s2432_s29 = sphi %s2510_s29, %s24_s29  }
   0x2   : > { %p422_p1 = scmp.lt.s32.totalorder %s2432_s29, 3 }
   0x4   : > { %p423_p2 = pnand %p1907_p0, %p422_p1 }
   0x5   : > { %p473_p3 = scmp.lt.s32.totalorder (!%p423_p2), %s2516_s30, 1  ;;  %s1912_s17 = sshll.u32 (!%p423_p2), %s2516_s30, 1 }
   0x6   : > { %426 = sbr.rel (%p423_p2) target bundleno = 1048 (0x418), region = 76  ;;  %p484_p4 = scmp.lt.s32.totalorder (!%p423_p2), %s1912_s17, 3 }
   0xb   : > { %v1921_v0 = vld [vmem:[%s2945_s2 + $0x78] sm:$0xff]  ;;  %v1920_v1 = vld [vmem:[%s2945_s2 + $0x70] sm:$0xff]  ;;  %vm489_vm0 = vcmask 523264   ;;  %v2434_v4 = vmov 0.0   ;;  %v1919_v5 = vld [vmem:[%s2945_s2 + $0x68] sm:$0xff]  ;;  %s474_s27 = scalar_select %p473_p3, %s2516_s30, 1 }
   0xc   : > { %v539_v2 = vld [vmem:[%s2945_s2 + $0x38] sm:$0xff]  ;;  %2144 = vmatprep.subr.mxu0 %v1921_v0  ;;  %v538_v3 = vld [vmem:[%s2945_s2 + $0x30] sm:$0xff]  ;;  %491 = vst.msk [vmem:[#allocation2 + $0x8] sm:$0xff] %vm489_vm0, %v2434_v4  ;;  %490 = vst.msk [vmem:[#allocation2] sm:$0xff] %vm489_vm0, %v2434_v4  ;;  %vm521_vm1 = vcmask 1040384   ;;  %vm737_vm2 = vcmask 1046528  }
   0xd   : > { %2166 = vmatprep.subr.mxu1 %v539_v2  ;;  %492 = vst.msk [vmem:[#allocation2 + $0x10] sm:$0xff] %vm489_vm0, %v2434_v4  ;;  %493 = vst.msk [vmem:[#allocation2 + $0x18] sm:$0xff] %vm489_vm0, %v2434_v4  ;;  %2145 = vmatpush3.msra.mxu0 %v1921_v0  ;;  %v537_v6 = vld [vmem:[%s2945_s2 + $0x28] sm:$0xff]  ;;  %v1918_v7 = vld [vmem:[%s2945_s2 + $0x60] sm:$0xff]  ;;  %s2024_s18 = sshll.u32 %s474_s27, 4  ;;  %s2959_s17 = smov (!%p484_p4, %s1912_s17), 3 }
   0xe   : > { %494 = vst.msk [vmem:[#allocation2 + $0x20] sm:$0xff] %vm489_vm0, %v2434_v4  ;;  %495 = vst.msk [vmem:[#allocation2 + $0x28] sm:$0xff] %vm489_vm0, %v2434_v4  ;;  %2167 = vmatpush3.msra.mxu1 %v539_v2  ;;  %2146 = vmatprep.subr.mxu0 %v1920_v1  ;;  %v536_v8 = vld [vmem:[%s2945_s2 + $0x20] sm:$0xff]  ;;  %v1917_v9 = vld [vmem:[%s2945_s2 + $0x58] sm:$0xff]  ;;  %s477_s23 = scalar_lea.vmem %s2943_s0, %s2024_s18  ;;  %s482_s26 = scalar_lea.vmem %s2944_s1, %s2024_s18 }
   0xf   : > { %496 = vst.msk [vmem:[#allocation2 + $0x30] sm:$0xff] %vm489_vm0, %v2434_v4  ;;  %497 = vst.msk [vmem:[#allocation2 + $0x38] sm:$0xff] %vm489_vm0, %v2434_v4  ;;  %2168 = vmatprep.subr.mxu1 %v538_v3  ;;  %2147 = vmatpush3.msra.mxu0 %v1920_v1  ;;  %v535_v10 = vld [vmem:[%s2945_s2 + $0x18] sm:$0xff]  ;;  %v498_v11 = vld [vmem:[%s477_s23] sm:$0xff]  ;;  %s1913_s18 = sshll.u32 %s2959_s17, 3 }
  0x10   : > { %2169 = vmatpush3.msra.mxu1 %v538_v3  ;;  %2148 = vmatprep.subr.mxu0 %v1919_v5  ;;  %v499_v12 = vld [vmem:[%s477_s23 + $0x8] sm:$0xff]  ;;  %500 = vst.msk [vmem:[#allocation2 + $0x8] sm:$0xff] %vm489_vm0, %v498_v11  ;;  %v502_v13 = vld [vmem:[%s482_s26] sm:$0xff]  ;;  %v1916_v14 = vld [vmem:[%s2945_s2 + $0x50] sm:$0xff]  ;;  %s487_s21 = scalar_lea.vmem %s2957_s14, %s1913_s18 }
  0x11   : > { %2170 = vmatprep.subr.mxu1 %v537_v6  ;;  %2149 = vmatpush3.msra.mxu0 %v1919_v5  ;;  %501 = vst.msk [vmem:[#allocation2 + $0x10] sm:$0xff] %vm489_vm0, %v499_v12  ;;  %v534_v15 = vld [vmem:[%s2945_s2 + $0x10] sm:$0xff]  ;;  %505 = vst.msk [vmem:[#allocation2 + $0x28] sm:$0xff] %vm489_vm0, %v502_v13  ;;  %v503_v16 = vld [vmem:[%s482_s26 + $0x8] sm:$0xff] }
  0x12   : > { %2171 = vmatpush3.msra.mxu1 %v537_v6  ;;  %2150 = vmatprep.subr.mxu0 %v1918_v7  ;;  %506 = vst.msk [vmem:[#allocation2 + $0x30] sm:$0xff] %vm489_vm0, %v503_v16  ;;  %v1915_v17 = vld [vmem:[%s2945_s2 + $0x48] sm:$0xff]  ;;  %v1914_v21 = vld [vmem:[%s2945_s2 + $0x40] sm:$0xff]  ;;  %v1937_v26 = vld [vmem:[%s2945_s2 + $0xb8] sm:$0xff] }
  0x13   : > { %2172 = vmatprep.subr.mxu1 %v536_v8  ;;  %2151 = vmatpush3.msra.mxu0 %v1918_v7  ;;  %v533_v18 = vld [vmem:[%s2945_s2 + $0x8] sm:$0xff]  ;;  %v507_v19 = vld [vmem:[#allocation2] sm:$0xff]  ;;  %v1936_v37 = vld [vmem:[%s2945_s2 + $0xb0] sm:$0xff] }
  0x14   : > { %2173 = vmatpush3.msra.mxu1 %v536_v8  ;;  %2152 = vmatprep.subr.mxu0 %v1917_v9  ;;  %v532_v22 = vld [vmem:[%s2945_s2] sm:$0xff]  ;;  %v2590_v23 = vrot.slane %v507_v19, 7  ;;  %v1935_v40 = vld [vmem:[%s2945_s2 + $0xa8] sm:$0xff]  ;;  %v1933_v44 = vld [vmem:[%s2945_s2 + $0x98] sm:$0xff] }
  0x15   : > { %2174 = vmatprep.subr.mxu1 %v535_v10  ;;  %2153 = vmatpush3.msra.mxu0 %v1917_v9  ;;  %v511_v20 = vld [vmem:[#allocation2 + $0x20] sm:$0xff]  ;;  %v510_v45 = vld [vmem:[#allocation2 + $0x18] sm:$0xff]  ;;  %v1932_v46 = vld [vmem:[%s2945_s2 + $0x90] sm:$0xff] }
  0x16   : > { %2175 = vmatpush3.msra.mxu1 %v535_v10  ;;  %2154 = vmatprep.subr.mxu0 %v1916_v14  ;;  %v2595_v27 = vrot.slane %v511_v20, 7  ;;  %v1934_v42 = vld [vmem:[%s2945_s2 + $0xa0] sm:$0xff]  ;;  %v1931_v47 = vld [vmem:[%s2945_s2 + $0x88] sm:$0xff]  ;;  %v2631_v48 = vrot.slane %v510_v45, 1  ;;  %v514_v51 = vld [vmem:[#allocation2 + $0x38] sm:$0xff] }
  0x17   : > { %2176 = vmatprep.subr.mxu1 %v534_v15  ;;  %2155 = vmatpush3.msra.mxu0 %v1916_v14  ;;  %v508_v24 = vld [vmem:[#allocation2 + $0x8] sm:$0xff]  ;;  %v1930_v52 = vld [vmem:[%s2945_s2 + $0x80] sm:$0xff]  ;;  %v2638_v54 = vrot.slane %v514_v51, 1  ;;  %v1955_v57 = vld [vmem:[%s2948_s5 + $0x78] sm:$0xff] }
  0x18   : > { %2177 = vmatpush3.msra.mxu1 %v534_v15  ;;  %2156 = vmatprep.subr.mxu0 %v1915_v17  ;;  %v509_v25 = vld [vmem:[#allocation2 + $0x10] sm:$0xff]  ;;  %v523_v29 = vrot.slane %v508_v24, 7  ;;  %v512_v30 = vld [vmem:[#allocation2 + $0x28] sm:$0xff]  ;;  %v738_v31 = vrot.slane %v508_v24, 1  ;;  %v939_v60 = vld [vmem:[%s2948_s5 + $0x38] sm:$0xff] }
  0x19   : > { %2178 = vmatprep.subr.mxu1 %v533_v18  ;;  %2157 = vmatpush3.msra.mxu0 %v1915_v17  ;;  %v525_v28 = vrot.slane %v509_v25, 7  ;;  %v528_v32 = vrot.slane %v512_v30, 7  ;;  %v513_v33 = vld [vmem:[#allocation2 + $0x30] sm:$0xff]  ;;  %v739_v34 = vrot.slane %v509_v25, 1  ;;  %v743_v49 = vrot.slane %v512_v30, 1  ;;  %v1953_v59 = vld [vmem:[%s2948_s5 + $0x68] sm:$0xff] }
  0x1a   : > { %2179 = vmatpush3.msra.mxu1 %v533_v18  ;;  %2158 = vmatprep.subr.mxu0 %v1914_v21  ;;  %v524_v35 = vsel %vm521_vm1, %v2590_v23, %v523_v29  ;;  %v530_v38 = vrot.slane %v513_v33, 7  ;;  %v744_v50 = vrot.slane %v513_v33, 1  ;;  %v1954_v58 = vld [vmem:[%s2948_s5 + $0x70] sm:$0xff]  ;;  %v1952_v61 = vld [vmem:[%s2948_s5 + $0x60] sm:$0xff]  ;;  %v1951_v63 = vld [vmem:[%s2948_s5 + $0x58] sm:$0xff] }
  0x1b   : > { %2160 = vmatprep.mubr.msk.f32.mxu0 %vm489_vm0, %v508_v24  ;;  %2159 = vmatpush3.msra.mxu0 %v1914_v21  ;;  %v526_v36 = vsel %vm521_vm1, %v523_v29, %v525_v28  ;;  %v529_v39 = vsel %vm521_vm1, %v2595_v27, %v528_v32  ;;  %v740_v43 = vsel %vm737_vm2, %v738_v31, %v739_v34  ;;  %v938_v62 = vld [vmem:[%s2948_s5 + $0x30] sm:$0xff]  ;;  %v937_v0 = vld [vmem:[%s2948_s5 + $0x28] sm:$0xff]  ;;  %v936_v2 = vld [vmem:[%s2948_s5 + $0x20] sm:$0xff] }
  0x1c   : > { %2180 = vmatprep.subr.mxu1 %v532_v22  ;;  %2161 = vmatmul.mubr.msk.f32.vlgmr.msra.gmra.mxu0 %vm489_vm0, %v509_v25  ;;  %v531_v41 = vsel %vm521_vm1, %v528_v32, %v530_v38  ;;  %v742_v53 = vsel %vm737_vm2, %v739_v34, %v2631_v48  ;;  %v745_v55 = vsel %vm737_vm2, %v743_v49, %v744_v50  ;;  %v1950_v1 = vld [vmem:[%s2948_s5 + $0x50] sm:$0xff]  ;;  %v1949_v3 = vld [vmem:[%s2948_s5 + $0x48] sm:$0xff]  ;;  %v935_v4 = vld [vmem:[%s2948_s5 + $0x18] sm:$0xff] }
  0x1d   : > { %2188 = vmatprep.subr.mxu0 %v1937_v26  ;;  %2181 = vmatpush3.msra.mxu1 %v532_v22  ;;  %v747_v56 = vsel %vm737_vm2, %v744_v50, %v2638_v54  ;;  %v1948_v5 = vld [vmem:[%s2948_s5 + $0x40] sm:$0xff]  ;;  %v934_v6 = vld [vmem:[%s2948_s5 + $0x10] sm:$0xff]  ;;  %v933_v7 = vld [vmem:[%s2948_s5 + $0x8] sm:$0xff] }
  0x1e   : > { %2182 = vmatprep.mubr.msk.f32.mxu1 %vm489_vm0, %v524_v35  ;;  %2189 = vmatpush3.msra.mxu0 %v1937_v26  ;;  %v2694_v8 = vld [vmem:[%s2948_s5 + $0xb8] sm:$0xff]  ;;  %v932_v9 = vld [vmem:[%s2948_s5] sm:$0xff] }
  0x1f   : > { %2183 = vmatmul.mubr.msk.f32.vlgmr.msra.gmra.mxu1 %vm489_vm0, %v526_v36  ;;  %2190 = vmatprep.subr.mxu0 %v1936_v37  ;;  %v1942_v19 = vld [vmem:[%s2946_s3] ss:$0 sm:$0xff] }
  0x20   : > { %2163 = vmatprep.mubr.msk.f32.mxu0 %vm489_vm0, %v512_v30  ;;  %2191 = vmatpush3.msra.mxu0 %v1936_v37  ;;  %v1943_v24 = vld [vmem:[%s2947_s4] ss:$0 sm:$0xff] }
  0x21   : > { %2185 = vmatprep.mubr.msk.f32.mxu1 %vm489_vm0, %v529_v39  ;;  %2192 = vmatprep.subr.mxu0 %v1935_v40 }
  0x22   : > { %2164 = vmatmul.mubr.msk.f32.gmra.mxu0 %vm489_vm0, %v513_v33  ;;  %2210 = vmatprep.subr.mxu1 %v1955_v57 }
  0x23   : > { %2193 = vmatpush3.msra.mxu0 %v1935_v40  ;;  %2186 = vmatmul.mubr.msk.f32.gmra.mxu1 %vm489_vm0, %v531_v41 }
  0x24   : > { %2194 = vmatprep.subr.mxu0 %v1934_v42  ;;  %2204 = vmatprep.mubr.msk.f32.mxu0 %vm489_vm0, %v740_v43 }
  0x25   : > { %2195 = vmatpush3.msra.mxu0 %v1934_v42  ;;  %2211 = vmatpush3.msra.mxu1 %v1955_v57 }
  0x26   : > { %2196 = vmatprep.subr.mxu0 %v1933_v44  ;;  %2212 = vmatprep.subr.mxu1 %v1954_v58 }
  0x27   : > { %2197 = vmatpush3.msra.mxu0 %v1933_v44  ;;  %2213 = vmatpush3.msra.mxu1 %v1954_v58 }
  0x28   : > { %2198 = vmatprep.subr.mxu0 %v1932_v46  ;;  %2214 = vmatprep.subr.mxu1 %v1953_v59 }
  0x29   : > { %2199 = vmatpush3.msra.mxu0 %v1932_v46  ;;  %2215 = vmatpush3.msra.mxu1 %v1953_v59 }
  0x2a   : > { %2200 = vmatprep.subr.mxu0 %v1931_v47  ;;  %2216 = vmatprep.subr.mxu1 %v1952_v61 }
  0x2b   : > { %2201 = vmatpush3.msra.mxu0 %v1931_v47  ;;  %2217 = vmatpush3.msra.mxu1 %v1952_v61 }
  0x2c   : > { %2202 = vmatprep.subr.mxu0 %v1930_v52  ;;  %2218 = vmatprep.subr.mxu1 %v1951_v63 }
  0x2d   : > { %2203 = vmatpush3.msra.mxu0 %v1930_v52  ;;  %2219 = vmatpush3.msra.mxu1 %v1951_v63 }
  0x2e   : > { %2205 = vmatmul.mubr.msk.f32.vlgmr.msra.gmra.mxu0 %vm489_vm0, %v742_v53  ;;  %2232 = vmatprep.subr.mxu0 %v939_v60 }
  0x2f   : > { %2207 = vmatprep.mubr.msk.f32.mxu0 %vm489_vm0, %v745_v55  ;;  %2233 = vmatpush3.msra.mxu0 %v939_v60 }
  0x30   : > { %2234 = vmatprep.subr.mxu0 %v938_v62  ;;  %2220 = vmatprep.subr.mxu1 %v1950_v1 }
  0x31   : > { %2235 = vmatpush3.msra.mxu0 %v938_v62  ;;  %2221 = vmatpush3.msra.mxu1 %v1950_v1 }
  0x32   : > { %2208 = vmatmul.mubr.msk.f32.gmra.mxu0 %vm489_vm0, %v747_v56  ;;  %2236 = vmatprep.subr.mxu0 %v937_v0 }
  0x33   : > { %2237 = vmatpush3.msra.mxu0 %v937_v0  ;;  %2222 = vmatprep.subr.mxu1 %v1949_v3 }
  0x34   : > { %2238 = vmatprep.subr.mxu0 %v936_v2  ;;  %2223 = vmatpush3.msra.mxu1 %v1949_v3 }
  0x35   : > { %2239 = vmatpush3.msra.mxu0 %v936_v2  ;;  %2224 = vmatprep.subr.mxu1 %v1948_v5 }
  0x36   : > { %2240 = vmatprep.subr.mxu0 %v935_v4  ;;  %2225 = vmatpush3.msra.mxu1 %v1948_v5 }
  0x37   : > { %2241 = vmatpush3.msra.mxu0 %v935_v4  ;;  %2254 = vmatprep.subr.mxu1 %v2694_v8  ;;  %v1970_v4 = vld [vmem:[%s2948_s5 + $0xb0] sm:$0xff] }
  0x38   : > { %2242 = vmatprep.subr.mxu0 %v934_v6 }
  0x39   : > { %2243 = vmatpush3.msra.mxu0 %v934_v6 }
  0x3a   : > { %2244 = vmatprep.subr.mxu0 %v933_v7 }
  0x3b   : > { %2245 = vmatpush3.msra.mxu0 %v933_v7 }
  0x3c   : > { %2246 = vmatprep.subr.mxu0 %v932_v9 }
  0x3d   : > { %2247 = vmatpush3.msra.mxu0 %v932_v9 }
  0xdc   : > { %v2162_v10 = vpop.f32.mrf.mxu0 }
  0xde   : > { %v623_v11 = vpop.f32.mrf.mxu0 }
  0xdf   : > { %v2184_v12 = vpop.f32.mrf.mxu1 }
  0xe0   : > { %v722_v17 = vadd.f32 %v2184_v12, %v2162_v10  ;;  %v1969_v10 = vld [vmem:[%s2948_s5 + $0xa8] sm:$0xff] }
  0xe1   : > { %v716_v14 = vpop.f32.mrf.mxu1 }
  0xe2   : > { %v2165_v13 = vpop.f32.mrf.mxu0  ;;  %v717_v20 = vadd.f32 %v716_v14, %v623_v11 }
  0xe3   : > { %v2187_v15 = vpop.f32.mrf.mxu1 }
  0xe4   : > { %v633_v16 = vpop.f32.mrf.mxu0  ;;  %v732_v26 = vadd.f32 %v2187_v15, %v2165_v13 }
  0xe5   : > { %v726_v22 = vpop.f32.mrf.mxu1 }
  0xe6   : > { %v727_v31 = vadd.f32 %v726_v22, %v633_v16 }
  0xee   : > { %v2206_v18 = vpop.f32.mrf.mxu0 }
  0xef   : > { %v851_v21 = vadd.f32 %v2206_v18, %v722_v17  ;;  %v1967_v18 = vld [vmem:[%s2948_s5 + $0x98] sm:$0xff] }
  0xf0   : > { %v831_v25 = vpop.f32.mrf.mxu0 }
  0xf1   : > { %v862_v28 = vmul.f32 %v1942_v19, %v851_v21  ;;  %v850_v29 = vadd.f32 %v831_v25, %v717_v20  ;;  %v1965_v20 = vld [vmem:[%s2948_s5 + $0x88] sm:$0xff]  ;;  %v1964_v21 = vld [vmem:[%s2948_s5 + $0x80] sm:$0xff] }
  0xf2   : > { %v2209_v30 = vpop.f32.mrf.mxu0 }
  0xf3   : > { %v873_v32 = vadd.f32 %v1943_v24, %v862_v28  ;;  %v861_v33 = vmul.f32 %v1942_v19, %v850_v29  ;;  %v853_v34 = vadd.f32 %v2209_v30, %v732_v26  ;;  %v1989_v29 = vld [vmem:[%s2951_s8 + $0x78] sm:$0xff]  ;;  %v1988_v30 = vld [vmem:[%s2951_s8 + $0x70] sm:$0xff] }
  0xf4   : > { %v841_v35 = vpop.f32.mrf.mxu0  ;;  %2276 = vmatprep.subr.mxu0 %v1989_v29 }
  0xf5   : > { %v1945_v36 = vmul.f32 -1.442695, %v873_v32  ;;  %v872_v37 = vadd.f32 %v1943_v24, %v861_v33  ;;  %v864_v38 = vmul.f32 %v1942_v19, %v853_v34  ;;  %v852_v39 = vadd.f32 %v841_v35, %v727_v31  ;;  %v1987_v31 = vld [vmem:[%s2951_s8 + $0x68] sm:$0xff]  ;;  %v1986_v33 = vld [vmem:[%s2951_s8 + $0x60] sm:$0xff]  ;;  %v1341_v34 = vld [vmem:[%s2951_s8 + $0x30] sm:$0xff] }
  0xf6   : > { %v1985_v35 = vld [vmem:[%s2951_s8 + $0x58] sm:$0xff] }
  0xf7   : > { %2370 = vpow2.f32 %v1945_v36  ;;  %v1944_v40 = vmul.f32 -1.442695, %v872_v37  ;;  %v875_v41 = vadd.f32 %v1943_v24, %v864_v38  ;;  %v863_v42 = vmul.f32 %v1942_v19, %v852_v39  ;;  %v1966_v19 = vld [vmem:[%s2948_s5 + $0x90] sm:$0xff]  ;;  %v1340_v36 = vld [vmem:[%s2951_s8 + $0x28] sm:$0xff]  ;;  %v1339_v38 = vld [vmem:[%s2951_s8 + $0x20] sm:$0xff] }
  0xf8   : > { %v1983_v39 = vld [vmem:[%s2951_s8 + $0x48] sm:$0xff] }
  0xf9   : > { %2372 = vpow2.f32 %v1944_v40  ;;  %v1947_v43 = vmul.f32 -1.442695, %v875_v41  ;;  %v874_v44 = vadd.f32 %v1943_v24, %v863_v42  ;;  %v1338_v40 = vld [vmem:[%s2951_s8 + $0x18] sm:$0xff]  ;;  %v1337_v42 = vld [vmem:[%s2951_s8 + $0x10] sm:$0xff] }
  0xfb   : > { %2374 = vpow2.f32 %v1947_v43  ;;  %v1946_v45 = vmul.f32 -1.442695, %v874_v44  ;;  %v1336_v43 = vld [vmem:[%s2951_s8 + $0x8] sm:$0xff] }
  0xfd   : > { %2376 = vpow2.f32 %v1946_v45  ;;  %v1335_v45 = vld [vmem:[%s2951_s8] sm:$0xff] }
 0x104   : > { %v2371_v46 = vpop.eup %2370 }
 0x105   : > { %v889_v47 = vadd.f32 1.0, %v2371_v46 }
 0x106   : > { %v2373_v49 = vpop.eup %2372 }
 0x107   : > { %2378 = vrcp.f32 %v889_v47  ;;  %v888_v50 = vadd.f32 1.0, %v2373_v49 }
 0x108   : > { %v2375_v51 = vpop.eup %2374 }
 0x109   : > { %2380 = vrcp.f32 %v888_v50  ;;  %v891_v52 = vadd.f32 1.0, %v2375_v51 }
 0x10a   : > { %v2377_v53 = vpop.eup %2376 }
 0x10b   : > { %2382 = vrcp.f32 %v891_v52  ;;  %v890_v55 = vadd.f32 1.0, %v2377_v53 }
 0x10d   : > { %2384 = vrcp.f32 %v890_v55 }
 0x114   : > { %v2379_v56 = vpop.eup %2378 }
 0x115   : > { %v2706_v57 = vmul.f32 %v2379_v56, %v873_v32  ;;  %v1342_v32 = vld [vmem:[%s2951_s8 + $0x38] sm:$0xff] }
 0x116   : > { %v2381_v58 = vpop.eup %2380 }
 0x117   : > { %905 = vst.msk [vmem:[#allocation2 + $0x10] sm:$0xff] %vm489_vm0, %v2706_v57  ;;  %v2710_v59 = vmul.f32 %v2381_v58, %v872_v37  ;;  %v1984_v37 = vld [vmem:[%s2951_s8 + $0x50] sm:$0xff]  ;;  %v1976_v58 = vld [vmem:[%s2949_s6] ss:$0 sm:$0xff] }
 0x118   : > { %v2383_v60 = vpop.eup %2382 }
 0x119   : > { %904 = vst.msk [vmem:[#allocation2 + $0x8] sm:$0xff] %vm489_vm0, %v2710_v59  ;;  %v2714_v61 = vmul.f32 %v2383_v60, %v875_v41  ;;  %v1982_v41 = vld [vmem:[%s2951_s8 + $0x40] sm:$0xff] }
 0x11a   : > { %v2385_v62 = vpop.eup %2384 }
 0x11b   : > { %907 = vst.msk [vmem:[#allocation2 + $0x30] sm:$0xff] %vm489_vm0, %v2714_v61  ;;  %v2718_v63 = vmul.f32 %v2385_v62, %v874_v44  ;;  %v2816_v44 = vld [vmem:[%s2951_s8 + $0xb8] sm:$0xff] }
 0x11d   : > { %906 = vst.msk [vmem:[#allocation2 + $0x28] sm:$0xff] %vm489_vm0, %v2718_v63 }
 0x11e   : > { %v910_v0 = vld [vmem:[#allocation2 + $0x10] sm:$0xff] }
 0x11f   : > { %v925_v3 = vrot.slane %v910_v0, 7  ;;  %v1138_v14 = vrot.slane %v910_v0, 1 }
 0x120   : > { %v909_v1 = vld [vmem:[#allocation2 + $0x8] sm:$0xff] }
 0x121   : > { %v923_v2 = vrot.slane %v909_v1, 7  ;;  %2226 = vmatprep.mubr.msk.f32.mxu1 %vm489_vm0, %v909_v1  ;;  %v1137_v6 = vrot.slane %v909_v1, 1  ;;  %v1141_v25 = vsel %vm737_vm2, %v1138_v14, %v2631_v48  ;;  %v1977_v1 = vld [vmem:[%s2950_s7] ss:$0 sm:$0xff] }
 0x122   : > { %2227 = vmatmul.mubr.msk.f32.vlgmr.msra.gmra.mxu1 %vm489_vm0, %v910_v0  ;;  %v914_v5 = vld [vmem:[#allocation2 + $0x30] sm:$0xff] }
 0x123   : > { %2255 = vmatpush3.msra.mxu1 %v2694_v8  ;;  %v924_v7 = vsel %vm521_vm1, %v2590_v23, %v923_v2  ;;  %v926_v9 = vsel %vm521_vm1, %v923_v2, %v925_v3  ;;  %v930_v13 = vrot.slane %v914_v5, 7  ;;  %v1968_v8 = vld [vmem:[%s2948_s5 + $0xa0] sm:$0xff]  ;;  %v1139_v15 = vsel %vm737_vm2, %v1137_v6, %v1138_v14 }
 0x124   : > { %2256 = vmatprep.subr.mxu1 %v1970_v4  ;;  %2248 = vmatprep.mubr.msk.f32.mxu0 %vm489_vm0, %v924_v7  ;;  %v913_v11 = vld [vmem:[#allocation2 + $0x28] sm:$0xff]  ;;  %v1143_v24 = vrot.slane %v914_v5, 1 }
 0x125   : > { %2257 = vmatpush3.msra.mxu1 %v1970_v4  ;;  %v928_v12 = vrot.slane %v913_v11, 7  ;;  %2229 = vmatprep.mubr.msk.f32.mxu1 %vm489_vm0, %v913_v11  ;;  %v1142_v22 = vrot.slane %v913_v11, 1 }
 0x126   : > { %2249 = vmatmul.mubr.msk.f32.vlgmr.msra.gmra.mxu0 %vm489_vm0, %v926_v9  ;;  %2258 = vmatprep.subr.mxu1 %v1969_v10  ;;  %v1146_v28 = vsel %vm737_vm2, %v1143_v24, %v2638_v54 }
 0x127   : > { %2230 = vmatmul.mubr.msk.f32.gmra.mxu1 %vm489_vm0, %v914_v5  ;;  %v929_v16 = vsel %vm521_vm1, %v2595_v27, %v928_v12  ;;  %v931_v17 = vsel %vm521_vm1, %v928_v12, %v930_v13  ;;  %v1144_v26 = vsel %vm737_vm2, %v1142_v22, %v1143_v24  ;;  %2277 = vmatpush3.msra.mxu0 %v1989_v29 }
 0x128   : > { %2259 = vmatpush3.msra.mxu1 %v1969_v10  ;;  %2270 = vmatprep.mubr.msk.f32.mxu1 %vm489_vm0, %v1139_v15 }
 0x129   : > { %2260 = vmatprep.subr.mxu1 %v1968_v8  ;;  %2251 = vmatprep.mubr.msk.f32.mxu0 %vm489_vm0, %v929_v16 }
 0x12a   : > { %2261 = vmatpush3.msra.mxu1 %v1968_v8  ;;  %2252 = vmatmul.mubr.msk.f32.gmra.mxu0 %vm489_vm0, %v931_v17 }
 0x12b   : > { %2262 = vmatprep.subr.mxu1 %v1967_v18  ;;  %2278 = vmatprep.subr.mxu0 %v1988_v30 }
 0x12c   : > { %2263 = vmatpush3.msra.mxu1 %v1967_v18  ;;  %2279 = vmatpush3.msra.mxu0 %v1988_v30 }
 0x12d   : > { %2264 = vmatprep.subr.mxu1 %v1966_v19  ;;  %2280 = vmatprep.subr.mxu0 %v1987_v31 }
 0x12e   : > { %2265 = vmatpush3.msra.mxu1 %v1966_v19  ;;  %2281 = vmatpush3.msra.mxu0 %v1987_v31 }
 0x12f   : > { %2266 = vmatprep.subr.mxu1 %v1965_v20  ;;  %2282 = vmatprep.subr.mxu0 %v1986_v33 }
 0x130   : > { %2267 = vmatpush3.msra.mxu1 %v1965_v20  ;;  %2283 = vmatpush3.msra.mxu0 %v1986_v33 }
 0x131   : > { %2268 = vmatprep.subr.mxu1 %v1964_v21  ;;  %2284 = vmatprep.subr.mxu0 %v1985_v35 }
 0x132   : > { %2269 = vmatpush3.msra.mxu1 %v1964_v21  ;;  %2285 = vmatpush3.msra.mxu0 %v1985_v35 }
 0x133   : > { %2271 = vmatmul.mubr.msk.f32.vlgmr.msra.gmra.mxu1 %vm489_vm0, %v1141_v25  ;;  %2298 = vmatprep.subr.mxu1 %v1342_v32 }
 0x134   : > { %2273 = vmatprep.mubr.msk.f32.mxu1 %vm489_vm0, %v1144_v26  ;;  %2299 = vmatpush3.msra.mxu1 %v1342_v32 }
 0x135   : > { %2300 = vmatprep.subr.mxu1 %v1341_v34  ;;  %2286 = vmatprep.subr.mxu0 %v1984_v37 }
 0x136   : > { %2301 = vmatpush3.msra.mxu1 %v1341_v34  ;;  %2287 = vmatpush3.msra.mxu0 %v1984_v37 }
 0x137   : > { %2274 = vmatmul.mubr.msk.f32.gmra.mxu1 %vm489_vm0, %v1146_v28  ;;  %2302 = vmatprep.subr.mxu1 %v1340_v36 }
 0x138   : > { %2303 = vmatpush3.msra.mxu1 %v1340_v36  ;;  %2288 = vmatprep.subr.mxu0 %v1983_v39 }
 0x139   : > { %2304 = vmatprep.subr.mxu1 %v1339_v38  ;;  %2289 = vmatpush3.msra.mxu0 %v1983_v39 }
 0x13a   : > { %2305 = vmatpush3.msra.mxu1 %v1339_v38  ;;  %2290 = vmatprep.subr.mxu0 %v1982_v41 }
 0x13b   : > { %2306 = vmatprep.subr.mxu1 %v1338_v40  ;;  %2291 = vmatpush3.msra.mxu0 %v1982_v41 }
 0x13c   : > { %2307 = vmatpush3.msra.mxu1 %v1338_v40  ;;  %2320 = vmatprep.subr.mxu0 %v2816_v44 }
 0x13d   : > { %2308 = vmatprep.subr.mxu1 %v1337_v42 }
 0x13e   : > { %2309 = vmatpush3.msra.mxu1 %v1337_v42 }
 0x13f   : > { %2310 = vmatprep.subr.mxu1 %v1336_v43 }
 0x140   : > { %2311 = vmatpush3.msra.mxu1 %v1336_v43 }
 0x141   : > { %2312 = vmatprep.subr.mxu1 %v1335_v45 }
 0x142   : > { %2313 = vmatpush3.msra.mxu1 %v1335_v45 }
 0x1e2   : > { %v2228_v46 = vpop.f32.mrf.mxu1 }
 0x1e4   : > { %v1023_v47 = vpop.f32.mrf.mxu1 }
 0x1e6   : > { %v2250_v49 = vpop.f32.mrf.mxu0 }
 0x1e7   : > { %v2231_v50 = vpop.f32.mrf.mxu1  ;;  %v1122_v55 = vadd.f32 %v2250_v49, %v2228_v46 }
 0x1e8   : > { %v1116_v51 = vpop.f32.mrf.mxu0 }
 0x1e9   : > { %v1033_v52 = vpop.f32.mrf.mxu1  ;;  %v1117_v60 = vadd.f32 %v1116_v51, %v1023_v47  ;;  %v2003_v51 = vld [vmem:[%s2951_s8 + $0xa8] sm:$0xff] }
 0x1ea   : > { %v2253_v53 = vpop.f32.mrf.mxu0 }
 0x1eb   : > { %v1132_v3 = vadd.f32 %v2253_v53, %v2231_v50 }
 0x1ec   : > { %v1126_v0 = vpop.f32.mrf.mxu0 }
 0x1ed   : > { %v1127_v7 = vadd.f32 %v1126_v0, %v1033_v52  ;;  %v2000_v0 = vld [vmem:[%s2951_s8 + $0x90] sm:$0xff] }
 0x1f3   : > { %v2272_v56 = vpop.f32.mrf.mxu1 }
 0x1f4   : > { %v1250_v62 = vadd.f32 %v2272_v56, %v1122_v55 }
 0x1f5   : > { %v1230_v2 = vpop.f32.mrf.mxu1 }
 0x1f6   : > { %v1261_v4 = vmul.f32 %v1976_v58, %v1250_v62  ;;  %v1249_v5 = vadd.f32 %v1230_v2, %v1117_v60  ;;  %v2001_v62 = vld [vmem:[%s2951_s8 + $0x98] sm:$0xff] }
 0x1f7   : > { %v2275_v6 = vpop.f32.mrf.mxu1 }
 0x1f8   : > { %v1272_v9 = vadd.f32 %v1977_v1, %v1261_v4  ;;  %v1260_v10 = vmul.f32 %v1976_v58, %v1249_v5  ;;  %v1252_v11 = vadd.f32 %v2275_v6, %v1132_v3 }
 0x1f9   : > { %v1240_v12 = vpop.f32.mrf.mxu1 }
 0x1fa   : > { %v1979_v13 = vmul.f32 -1.442695, %v1272_v9  ;;  %v1271_v14 = vadd.f32 %v1977_v1, %v1260_v10  ;;  %v1263_v8 = vmul.f32 %v1976_v58, %v1252_v11  ;;  %v1251_v15 = vadd.f32 %v1240_v12, %v1127_v7  ;;  %v1719_v7 = vld [vmem:[%s2954_s11 + $0x38] sm:$0xff]  ;;  %v1714_v11 = vld [vmem:[%s2954_s11 + $0x10] sm:$0xff]  ;;  %v1713_v12 = vld [vmem:[%s2954_s11 + $0x8] sm:$0xff] }
 0x1fb   : > { %2342 = vmatprep.subr.mxu1 %v1719_v7  ;;  %v1715_v10 = vld [vmem:[%s2954_s11 + $0x18] sm:$0xff] }
 0x1fc   : > { %2386 = vpow2.f32 %v1979_v13  ;;  %v1978_v16 = vmul.f32 -1.442695, %v1271_v14  ;;  %v1274_v17 = vadd.f32 %v1977_v1, %v1263_v8  ;;  %v1262_v18 = vmul.f32 %v1976_v58, %v1251_v15  ;;  %v1712_v13 = vld [vmem:[%s2954_s11] sm:$0xff] }
 0x1fe   : > { %2388 = vpow2.f32 %v1978_v16  ;;  %v1981_v19 = vmul.f32 -1.442695, %v1274_v17  ;;  %v1273_v20 = vadd.f32 %v1977_v1, %v1262_v18  ;;  %v1998_v1 = vld [vmem:[%s2951_s8 + $0x80] sm:$0xff] }
 0x200   : > { %2390 = vpow2.f32 %v1981_v19  ;;  %v1980_v21 = vmul.f32 -1.442695, %v1273_v20 }
 0x202   : > { %2392 = vpow2.f32 %v1980_v21 }
 0x209   : > { %v2387_v22 = vpop.eup %2386 }
 0x20a   : > { %v1288_v24 = vadd.f32 1.0, %v2387_v22  ;;  %v2010_v22 = vld [vmem:[%s2952_s9] ss:$0 sm:$0xff] }
 0x20b   : > { %v2389_v25 = vpop.eup %2388 }
 0x20c   : > { %2394 = vrcp.f32 %v1288_v24  ;;  %v1287_v26 = vadd.f32 1.0, %v2389_v25 }
 0x20d   : > { %v2391_v28 = vpop.eup %2390 }
 0x20e   : > { %2396 = vrcp.f32 %v1287_v26  ;;  %v1290_v29 = vadd.f32 1.0, %v2391_v28  ;;  %v2011_v28 = vld [vmem:[%s2953_s10] ss:$0 sm:$0xff] }
 0x20f   : > { %v2393_v30 = vpop.eup %2392 }
 0x210   : > { %2398 = vrcp.f32 %v1290_v29  ;;  %v1289_v31 = vadd.f32 1.0, %v2393_v30 }
 0x212   : > { %2400 = vrcp.f32 %v1289_v31 }
 0x219   : > { %v2395_v32 = vpop.eup %2394 }
 0x21a   : > { %v1300_v33 = vmul.f32 %v2395_v32, %v1272_v9  ;;  %v1717_v9 = vld [vmem:[%s2954_s11 + $0x28] sm:$0xff] }
 0x21b   : > { %v2397_v34 = vpop.eup %2396 }
 0x21c   : > { %v2829_v35 = vadd.f32 %v1300_v33, %v2706_v57  ;;  %v1299_v36 = vmul.f32 %v2397_v34, %v1271_v14 }
 0x21d   : > { %v2399_v37 = vpop.eup %2398 }
 0x21e   : > { %1308 = vst.msk [vmem:[#allocation2 + $0x10] sm:$0xff] %vm489_vm0, %v2829_v35  ;;  %v2834_v38 = vadd.f32 %v1299_v36, %v2710_v59  ;;  %v1302_v39 = vmul.f32 %v2399_v37, %v1274_v17 }
 0x21f   : > { %v2401_v40 = vpop.eup %2400 }
 0x220   : > { %1307 = vst.msk [vmem:[#allocation2 + $0x8] sm:$0xff] %vm489_vm0, %v2834_v38  ;;  %v2839_v41 = vadd.f32 %v1302_v39, %v2714_v61  ;;  %v1301_v42 = vmul.f32 %v2401_v40, %v1273_v20  ;;  %v2004_v61 = vld [vmem:[%s2951_s8 + $0xb0] sm:$0xff] }
 0x222   : > { %1310 = vst.msk [vmem:[#allocation2 + $0x30] sm:$0xff] %vm489_vm0, %v2839_v41  ;;  %v2844_v57 = vadd.f32 %v1301_v42, %v2718_v63 }
 0x224   : > { %1309 = vst.msk [vmem:[#allocation2 + $0x28] sm:$0xff] %vm489_vm0, %v2844_v57 }
 0x225   : > { %v1313_v59 = vld [vmem:[#allocation2 + $0x10] sm:$0xff] }
 0x226   : > { %v1328_v46 = vrot.slane %v1313_v59, 7  ;;  %v1541_v56 = vrot.slane %v1313_v59, 1 }
 0x227   : > { %v1312_v43 = vld [vmem:[#allocation2 + $0x8] sm:$0xff] }
 0x228   : > { %v1326_v45 = vrot.slane %v1312_v43, 7  ;;  %2292 = vmatprep.mubr.msk.f32.mxu0 %vm489_vm0, %v1312_v43  ;;  %v1540_v49 = vrot.slane %v1312_v43, 1  ;;  %v1544_v4 = vsel %vm737_vm2, %v1541_v56, %v2631_v48  ;;  %v1718_v48 = vld [vmem:[%s2954_s11 + $0x30] sm:$0xff] }
 0x229   : > { %2293 = vmatmul.mubr.msk.f32.vlgmr.msra.gmra.mxu0 %vm489_vm0, %v1313_v59  ;;  %v1317_v47 = vld [vmem:[#allocation2 + $0x30] sm:$0xff] }
 0x22a   : > { %2321 = vmatpush3.msra.mxu0 %v2816_v44  ;;  %v1327_v63 = vsel %vm521_vm1, %v2590_v23, %v1326_v45  ;;  %v1329_v50 = vsel %vm521_vm1, %v1326_v45, %v1328_v46  ;;  %v1333_v55 = vrot.slane %v1317_v47, 7  ;;  %v2002_v23 = vld [vmem:[%s2951_s8 + $0xa0] sm:$0xff]  ;;  %v1542_v44 = vsel %vm737_vm2, %v1540_v49, %v1541_v56 }
 0x22b   : > { %2322 = vmatprep.subr.mxu0 %v2004_v61  ;;  %2314 = vmatprep.mubr.msk.f32.mxu1 %vm489_vm0, %v1327_v63  ;;  %v1316_v52 = vld [vmem:[#allocation2 + $0x28] sm:$0xff]  ;;  %v1546_v3 = vrot.slane %v1317_v47, 1 }
 0x22c   : > { %2323 = vmatpush3.msra.mxu0 %v2004_v61  ;;  %v1331_v53 = vrot.slane %v1316_v52, 7  ;;  %2295 = vmatprep.mubr.msk.f32.mxu0 %vm489_vm0, %v1316_v52  ;;  %v1545_v2 = vrot.slane %v1316_v52, 1 }
 0x22d   : > { %2315 = vmatmul.mubr.msk.f32.vlgmr.msra.gmra.mxu1 %vm489_vm0, %v1329_v50  ;;  %2324 = vmatprep.subr.mxu0 %v2003_v51  ;;  %v1549_v6 = vsel %vm737_vm2, %v1546_v3, %v2638_v54  ;;  %v1716_v54 = vld [vmem:[%s2954_s11 + $0x20] sm:$0xff] }
 0x22e   : > { %2296 = vmatmul.mubr.msk.f32.gmra.mxu0 %vm489_vm0, %v1317_v47  ;;  %v1332_v58 = vsel %vm521_vm1, %v2595_v27, %v1331_v53  ;;  %v1334_v60 = vsel %vm521_vm1, %v1331_v53, %v1333_v55  ;;  %v1999_v27 = vld [vmem:[%s2951_s8 + $0x88] sm:$0xff]  ;;  %v1547_v5 = vsel %vm737_vm2, %v1545_v2, %v1546_v3  ;;  %2343 = vmatpush3.msra.mxu1 %v1719_v7 }
 0x22f   : > { %2325 = vmatpush3.msra.mxu0 %v2003_v51  ;;  %2336 = vmatprep.mubr.msk.f32.mxu0 %vm489_vm0, %v1542_v44 }
 0x230   : > { %2326 = vmatprep.subr.mxu0 %v2002_v23  ;;  %2317 = vmatprep.mubr.msk.f32.mxu1 %vm489_vm0, %v1332_v58 }
 0x231   : > { %2327 = vmatpush3.msra.mxu0 %v2002_v23  ;;  %2318 = vmatmul.mubr.msk.f32.gmra.mxu1 %vm489_vm0, %v1334_v60 }
 0x232   : > { %2328 = vmatprep.subr.mxu0 %v2001_v62  ;;  %2344 = vmatprep.subr.mxu1 %v1718_v48 }
 0x233   : > { %2329 = vmatpush3.msra.mxu0 %v2001_v62  ;;  %2345 = vmatpush3.msra.mxu1 %v1718_v48 }
 0x234   : > { %2330 = vmatprep.subr.mxu0 %v2000_v0  ;;  %2346 = vmatprep.subr.mxu1 %v1717_v9 }
 0x235   : > { %2331 = vmatpush3.msra.mxu0 %v2000_v0  ;;  %2347 = vmatpush3.msra.mxu1 %v1717_v9 }
 0x236   : > { %2332 = vmatprep.subr.mxu0 %v1999_v27  ;;  %2348 = vmatprep.subr.mxu1 %v1716_v54 }
 0x237   : > { %2333 = vmatpush3.msra.mxu0 %v1999_v27  ;;  %2349 = vmatpush3.msra.mxu1 %v1716_v54 }
 0x238   : > { %2334 = vmatprep.subr.mxu0 %v1998_v1  ;;  %2350 = vmatprep.subr.mxu1 %v1715_v10 }
 0x239   : > { %2335 = vmatpush3.msra.mxu0 %v1998_v1  ;;  %2351 = vmatpush3.msra.mxu1 %v1715_v10  ;;  %v2018_v10 = vld [vmem:[%s2955_s12] ss:$0 sm:$0xff] }
 0x23a   : > { %2337 = vmatmul.mubr.msk.f32.vlgmr.msra.gmra.mxu0 %vm489_vm0, %v1544_v4  ;;  %2352 = vmatprep.subr.mxu1 %v1714_v11 }
 0x23b   : > { %2339 = vmatprep.mubr.msk.f32.mxu0 %vm489_vm0, %v1547_v5  ;;  %2353 = vmatpush3.msra.mxu1 %v1714_v11 }
 0x23c   : > { %2354 = vmatprep.subr.mxu1 %v1713_v12 }
 0x23d   : > { %2355 = vmatpush3.msra.mxu1 %v1713_v12 }
 0x23e   : > { %2340 = vmatmul.mubr.msk.f32.gmra.mxu0 %vm489_vm0, %v1549_v6  ;;  %2356 = vmatprep.subr.mxu1 %v1712_v13 }
 0x23f   : > { %2357 = vmatpush3.msra.mxu1 %v1712_v13 }
 0x2e9   : > { %v2294_v14 = vpop.f32.mrf.mxu0 }
 0x2eb   : > { %v1426_v8 = vpop.f32.mrf.mxu0 }
 0x2ed   : > { %v2316_v15 = vpop.f32.mrf.mxu1 }
 0x2ee   : > { %v2297_v16 = vpop.f32.mrf.mxu0  ;;  %v1525_v20 = vadd.f32 %v2316_v15, %v2294_v14 }
 0x2ef   : > { %v1519_v17 = vpop.f32.mrf.mxu1 }
 0x2f0   : > { %v1436_v18 = vpop.f32.mrf.mxu0  ;;  %v1520_v24 = vadd.f32 %v1519_v17, %v1426_v8 }
 0x2f1   : > { %v2319_v19 = vpop.f32.mrf.mxu1 }
 0x2f2   : > { %v1535_v30 = vadd.f32 %v2319_v19, %v2297_v16 }
 0x2f3   : > { %v1529_v26 = vpop.f32.mrf.mxu1 }
 0x2f4   : > { %v1530_v34 = vadd.f32 %v1529_v26, %v1436_v18 }
 0x2fa   : > { %v2338_v21 = vpop.f32.mrf.mxu0 }
 0x2fb   : > { %v1653_v25 = vadd.f32 %v2338_v21, %v1525_v20 }
 0x2fc   : > { %v1633_v29 = vpop.f32.mrf.mxu0 }
 0x2fd   : > { %v1664_v31 = vmul.f32 %v2010_v22, %v1653_v25  ;;  %v1652_v32 = vadd.f32 %v1633_v29, %v1520_v24 }
 0x2fe   : > { %v2341_v33 = vpop.f32.mrf.mxu0 }
 0x2ff   : > { %v1675_v36 = vadd.f32 %v2011_v28, %v1664_v31  ;;  %v1663_v37 = vmul.f32 %v2010_v22, %v1652_v32  ;;  %v1655_v39 = vadd.f32 %v2341_v33, %v1535_v30 }
 0x300   : > { %v1643_v40 = vpop.f32.mrf.mxu0 }
 0x301   : > { %v2013_v42 = vmul.f32 -1.442695, %v1675_v36  ;;  %v1674_v59 = vadd.f32 %v2011_v28, %v1663_v37  ;;  %v1666_v43 = vmul.f32 %v2010_v22, %v1655_v39  ;;  %v1654_v45 = vadd.f32 %v1643_v40, %v1530_v34 }
 0x303   : > { %2402 = vpow2.f32 %v2013_v42  ;;  %v2012_v46 = vmul.f32 -1.442695, %v1674_v59  ;;  %v1677_v61 = vadd.f32 %v2011_v28, %v1666_v43  ;;  %v1665_v47 = vmul.f32 %v2010_v22, %v1654_v45 }
 0x305   : > { %2404 = vpow2.f32 %v2012_v46  ;;  %v2015_v49 = vmul.f32 -1.442695, %v1677_v61  ;;  %v1676_v63 = vadd.f32 %v2011_v28, %v1665_v47 }
 0x307   : > { %2406 = vpow2.f32 %v2015_v49  ;;  %v2014_v50 = vmul.f32 -1.442695, %v1676_v63 }
 0x309   : > { %2408 = vpow2.f32 %v2014_v50 }
 0x310   : > { %v2403_v51 = vpop.eup %2402 }
 0x311   : > { %v1691_v53 = vadd.f32 1.0, %v2403_v51 }
 0x312   : > { %v2405_v52 = vpop.eup %2404 }
 0x313   : > { %v1690_v55 = vadd.f32 1.0, %v2405_v52 }
 0x314   : > { %v2407_v56 = vpop.eup %2406 }
 0x315   : > { %2410 = vrcp.f32 %v1690_v55  ;;  %v1693_v23 = vadd.f32 1.0, %v2407_v56 }
 0x316   : > { %v2409_v44 = vpop.eup %2408  ;;  %2412 = vrcp.f32 %v1691_v53 }
 0x317   : > { %2414 = vrcp.f32 %v1693_v23  ;;  %v1692_v58 = vadd.f32 1.0, %v2409_v44 }
 0x319   : > { %2416 = vrcp.f32 %v1692_v58 }
 0x322   : > { %v2411_v60 = vpop.eup %2410 }
 0x323   : > { %v2413_v62 = vpop.eup %2412  ;;  %v1702_v27 = vmul.f32 %v2411_v60, %v1674_v59 }
 0x324   : > { %v2415_v0 = vpop.eup %2414  ;;  %v1703_v3 = vmul.f32 %v2413_v62, %v1675_v36 }
 0x325   : > { %v1705_v1 = vmul.f32 %v2415_v0, %v1677_v61  ;;  %v1706_v6 = vadd.f32 %v1702_v27, %v2834_v38  ;;  %v2019_v38 = vld [vmem:[%s2956_s13] ss:$0 sm:$0xff] }
 0x326   : > { %v2417_v2 = vpop.eup %2416  ;;  %v1707_v48 = vadd.f32 %v1703_v3, %v2829_v35 }
 0x327   : > { %v1704_v4 = vmul.f32 %v2417_v2, %v1676_v63  ;;  %v1709_v5 = vadd.f32 %v1705_v1, %v2839_v41 }
 0x329   : > { %v1708_v7 = vadd.f32 %v1704_v4, %v2844_v57  ;;  %v1711_v54 = vadd.f32 %v1709_v5, %v1707_v48 }
 0x32b   : > { %v1710_v9 = vadd.f32 %v1708_v7, %v1706_v6 }
 0x32d   : > { %2358 = vmatprep.mubr.msk.f32.mxu1 %vm489_vm0, %v1710_v9 }
 0x32e   : > { %2359 = vmatmul.mubr.msk.f32.vlgmr.msra.gmra.mxu1 %vm489_vm0, %v1711_v54 }
 0x3ee   : > { %v2360_v11 = vpop.f32.mrf.mxu1 }
 0x3ef   : > { %v1809_v41 = vmul.f32 %v2360_v11, %v2018_v10 }
 0x3f0   : > { %v1792_v57 = vpop.f32.mrf.mxu1 }
 0x3f1   : > { %v1818_v12 = vadd.f32 %v2019_v38, %v1809_v41  ;;  %v1808_v35 = vmul.f32 %v2018_v10, %v1792_v57 }
 0x3f3   : > { %v2021_v13 = vmul.f32 -1.442695, %v1818_v12  ;;  %v1817_v14 = vadd.f32 %v2019_v38, %v1808_v35 }
 0x3f5   : > { %2418 = vpow2.f32 %v2021_v13  ;;  %v2020_v8 = vmul.f32 -1.442695, %v1817_v14 }
 0x3f7   : > { %2420 = vpow2.f32 %v2020_v8 }
 0x402   : > { %v2419_v15 = vpop.eup %2418 }
 0x403   : > { %v1826_v16 = vadd.f32 1.0, %v2419_v15 }
 0x404   : > { %v2421_v17 = vpop.eup %2420 }
 0x405   : > { %v1825_v18 = vadd.f32 1.0, %v2421_v17  ;;  %2422 = vrcp.f32 %v1826_v16 }
 0x407   : > { %2424 = vrcp.f32 %v1825_v18 }
 0x412   : > { %v2423_v19 = vpop.eup %2422 }
 0x413   : > { %v1832_v22 = vmul.f32 %v2423_v19, %v1818_v12 }
 0x414   : > { %v2425_v20 = vpop.eup %2424 }
 0x415   : > { %v1831_v21 = vmul.f32 %v2425_v20, %v1817_v14  ;;  %1834 = vst [vmem:[%s487_s21 + $0x8] sm:$0xff] %v1832_v22 }
 0x417   : > { %1833 = vst [vmem:[%s487_s21] sm:$0xff] %v1831_v21 }
 0x418 PF: > { %s24_s29 = sadd.s32 1, %s2432_s29  }
 0x419   : > { %p21_p5 = scmp.ge.s32.totalorder %s24_s29, 4  }
 0x41b   :  { %23 = sbr.rel (!%p21_p5) target bundleno = 1 (0x1), region = 116 }

</bundles_post_ra>
